<compile_context>
chip_gen: v7x
topology: tpu7x:2x2x1
jax: 0.10.0
libtpu: 0.0.40
codegen_flags: <defaults>
</compile_context>

<pallas_src>
import numpy as np

import jax
import jax.numpy as jnp
from jax.experimental import pallas as pl
from jax.experimental.pallas import tpu as pltpu


def sinusoid_encoding_table(n_position, d_hid):
    """Replicates PositionalEncoding._get_sinusoid_encoding_table exactly."""

    def get_position_angle_vec(position):
        return [position / np.power(10000, 2 * (hid_j // 2) / d_hid)
                for hid_j in range(d_hid)]

    table = np.array([get_position_angle_vec(p) for p in range(n_position)],
                     dtype=np.float64)                    # (n_position, d_hid)
    table[0::2] = np.sin(table[0::2])                     # even position rows
    table[1::2] = np.cos(table[1::2])                     # odd position rows
    # torch .unsqueeze(1) -> (n_position, 1, d_hid)
    return jnp.asarray(table[:, None, :], dtype=jnp.float32)


def _pos_add_kernel(x_ref, pos_ref, out_ref):
    # x_ref  : (TS, B, D)
    # pos_ref: (TS, 1, D)  -- broadcast over batch in-kernel (sublane broadcast)
    x = x_ref[...].astype(jnp.float32)
    pos = jnp.broadcast_to(pos_ref[...], x.shape).astype(jnp.float32)
    out_ref[...] = (x + pos).astype(out_ref.dtype)


def _pick_row_tile(S):
    # One block for small S; otherwise tile the position axis in big
    # 8-aligned chunks (keeps VMEM bounded on v7x, grid stays "parallel").
    for ts in (1024, 512, 256):
        if S > ts and S % ts == 0:
            return ts
    return S


def positional_encoding(x, pos_table):
    """x: (S, B, D) sequence-first; pos_table: (n_position, 1, D), n_position == S."""
    S, B, D = x.shape
    assert pos_table.shape[0] == S and pos_table.shape[2] == D, (
        "forward broadcast requires x.shape[0] == n_position and matching d_hid")

    out_dtype = jnp.promote_types(x.dtype, pos_table.dtype)
    ts = _pick_row_tile(S)

    return pl.pallas_call(
        _pos_add_kernel,
        out_shape=jax.ShapeDtypeStruct((S, B, D), out_dtype),
        grid=(S // ts,),
        in_specs=[
            pl.BlockSpec((ts, B, D), lambda i: (i, 0, 0)),   # x
            pl.BlockSpec((ts, 1, D), lambda i: (i, 0, 0)),   # pos_table
        ],
        out_specs=pl.BlockSpec((ts, B, D), lambda i: (i, 0, 0)),
        compiler_params=pltpu.CompilerParams(
            dimension_semantics=("parallel",)),
    )(x, pos_table)


if __name__ == "__main__":
    # Small shapes consistent with the module: d_hid=32, n_position=16 (= seq
    # length S, sequence-first layout), batch B=2.
    S, B, D = 16, 2, 32

    pos_table = sinusoid_encoding_table(n_position=S, d_hid=D)   # (S, 1, D)

    key = jax.random.PRNGKey(0)
    x = jax.random.normal(key, (S, B, D), jnp.float32)

    out = positional_encoding(x, pos_table)
    out = jax.block_until_ready(out)

    # Pure-JAX reference mirroring the torch forward exactly.
    ref = x + pos_table[:, :x.shape[1]]
    if not jnp.allclose(out, ref, atol=1e-6, rtol=1e-6):
        raise AssertionError("Pallas kernel does not match JAX reference")
    print("KERNEL_OK")
</pallas_src>

<mosaic_0001>
module attributes {stable_mosaic.version = 11 : i64} {
  func.func @_pos_add_kernel(%arg0: i32, %arg1: memref<16x2x32xf32, #tpu.memory_space<vmem>>, %arg2: memref<16x1x32xf32, #tpu.memory_space<vmem>>, %arg3: memref<16x2x32xf32, #tpu.memory_space<vmem>>) attributes {dimension_semantics = [#tpu.dimension_semantics<parallel>], iteration_bounds = array<i64: 1>, scalar_prefetch = 0 : i64, scratch_operands = 0 : i64, tpu.core_type = #tpu.core_type<tc>, window_params = [{transform_indices = @transform_0, window_bounds = array<i64: 16, 2, 32>}, {transform_indices = @transform_1, window_bounds = array<i64: 16, 1, 32>}, {transform_indices = @transform_2, window_bounds = array<i64: 16, 2, 32>}]} {
    %c0 = arith.constant 0 : index
    %c0_0 = arith.constant 0 : index
    %c0_1 = arith.constant 0 : index
    %0 = vector.load %arg1[%c0, %c0_0, %c0_1] : memref<16x2x32xf32, #tpu.memory_space<vmem>>, vector<16x2x32xf32>
    %c0_2 = arith.constant 0 : index
    %c0_3 = arith.constant 0 : index
    %c0_4 = arith.constant 0 : index
    %1 = vector.load %arg2[%c0_2, %c0_3, %c0_4] : memref<16x1x32xf32, #tpu.memory_space<vmem>>, vector<16x1x32xf32>
    %2 = vector.shape_cast %1 : vector<16x1x32xf32> to vector<16x1x32xf32>
    %3 = vector.broadcast %2 : vector<16x1x32xf32> to vector<16x2x32xf32>
    %4 = arith.addf %0, %3 : vector<16x2x32xf32>
    %c0_5 = arith.constant 0 : index
    %c0_6 = arith.constant 0 : index
    %c0_7 = arith.constant 0 : index
    %5 = vector.load %arg3[%c0_5, %c0_6, %c0_7] : memref<16x2x32xf32, #tpu.memory_space<vmem>>, vector<16x2x32xf32>
    tpu.vector_store %arg3[%c0_5, %c0_6, %c0_7], %4 {strides = array<i32>} : memref<16x2x32xf32, #tpu.memory_space<vmem>>, vector<16x2x32xf32>,
    return
  }
  func.func @transform_0(%arg0: i32) -> (i32, i32, i32) {
    %c0_i32 = arith.constant 0 : i32
    %c0_i32_0 = arith.constant 0 : i32
    %c0_i32_1 = arith.constant 0 : i32
    return %arg0, %c0_i32, %c0_i32_0 : i32, i32, i32
  }
  func.func @transform_1(%arg0: i32) -> (i32, i32, i32) {
    %c0_i32 = arith.constant 0 : i32
    %c0_i32_0 = arith.constant 0 : i32
    %c0_i32_1 = arith.constant 0 : i32
    return %arg0, %c0_i32, %c0_i32_0 : i32, i32, i32
  }
  func.func @transform_2(%arg0: i32) -> (i32, i32, i32) {
    %c0_i32 = arith.constant 0 : i32
    %c0_i32_0 = arith.constant 0 : i32
    %c0_i32_1 = arith.constant 0 : i32
    return %arg0, %c0_i32, %c0_i32_0 : i32, i32, i32
  }
}

</mosaic_0001>

<bundles_post_ra>
// kernel: tpu_custom_call.1
= control target key start
LH: loop header
LB: loop body
LE: loop exit
PB: predicated region body
PF: predicated region fallthrough
CT: control target
= control target key end

     0   :  { %7 = vsyncpa [#allocation3], 0  ;;  %s397_s0 = inlined_call_operand.hbm [shape: f32[16,2,32], index: 0, kind: input, shape index: {}]   ;;  %s398_s1 = inlined_call_operand.hbm [shape: f32[16,1,32], index: 1, kind: input, shape index: {}]   ;;  %s399_s2 = inlined_call_operand.hbm [shape: f32[16,2,32], index: 2, kind: output, shape index: {}]  }
   0x1   :  { %8 = vsyncpa [#allocation6], 0 }
   0x2   :  { %9 = vsyncpa [#allocation4], 0  ;;  %s314_s9 = smov [#allocation2]   ;;  %s242_s13 = scalar_lea.hbm %s397_s0, 512 }
   0x3   :  { %s15_s10 = sshll.u32 %s314_s9, 4  ;;  %p243_p0 = scmp.ne.s32.totalorder %s397_s0, %s242_s13  ;;  %s16_s10 = int_to_ptr.vmem [resolvable:$true] %s15_s10 }
   0x4   :  { %p246_p1 = scmp.lt.u32.totalorder %s242_s13, %s397_s0 }
   0x6   :  { %p248_p2 = pnand %p246_p1, %p243_p0 }
   0x8   :  { %251 = shalt.err (!%p248_p2)
}
   0x9   :  { %s252_s18 = scalar_lea.vmem %s16_s10, 512  ;;  %p257_p4 = scmp.lt.s32.totalorder %s16_s10, %s16_s10 }
   0xa   :  { %p253_p3 = scmp.ne.s32.totalorder %s16_s10, %s252_s18  ;;  %p258_p5 = scmp.lt.s32.totalorder %s252_s18, %s252_s18 }
   0xc   :  { %p259_p6 = por %p258_p5, %p257_p4 }
   0xe   :  { %p260_p7 = pnand %p259_p6, %p253_p3 }
  0x10   :  { %263 = shalt.err (!%p260_p7)
}
  0x11   :  { %s315_s19 = smov 32   ;;  %s316_s20 = smov 2  }
  0x12   :  { %21 = dma.hbm_to_vmem [thread:$0]  %s397_s0, 512, %s16_s10, [#allocation3], %s315_s19, %s315_s19, %s316_s20  }
  0x13   :  { %s317_s23 = smov [#allocation5]   ;;  %s264_s27 = scalar_lea.hbm %s398_s1, 256 }
  0x14   :  { %s27_s24 = sshll.u32 %s317_s23, 4  ;;  %p265_p8 = scmp.ne.s32.totalorder %s398_s1, %s264_s27  ;;  %s28_s24 = int_to_ptr.vmem [resolvable:$true] %s27_s24 }
  0x15   :  { %p268_p9 = scmp.lt.u32.totalorder %s264_s27, %s398_s1 }
  0x17   :  { %p270_p10 = pnand %p268_p9, %p265_p8 }
  0x19   :  { %273 = shalt.err (!%p270_p10)
}
  0x1a   :  { %s274_s4 = scalar_lea.vmem %s28_s24, 256  ;;  %p279_p12 = scmp.lt.s32.totalorder %s28_s24, %s28_s24 }
  0x1b   :  { %p275_p11 = scmp.ne.s32.totalorder %s28_s24, %s274_s4  ;;  %p280_p13 = scmp.lt.s32.totalorder %s274_s4, %s274_s4 }
  0x1d   :  { %p281_p0 = por %p280_p13, %p279_p12 }
  0x1f   :  { %p282_p1 = pnand %p281_p0, %p275_p11 }
  0x21   :  { %285 = shalt.err (!%p282_p1)
}
  0x22   :  { %s318_s0 = smov 16   ;;  %s319_s5 = smov 1  }
  0x23   :  { %33 = dma.hbm_to_vmem [thread:$0]  %s398_s1, 256, %s28_s24, [#allocation6], %s318_s0, %s318_s0, %s319_s5  }
  0x24   :  { %308 = dma.done.wait [#allocation3], 512  }
  0x25   :  { %309 = vsyncadd [#allocation3], 4294966784 }
  0x26   :  { %310 = dma.done.wait [#allocation6], 256  }
  0x27   :  { %311 = vsyncadd [#allocation6], 4294967040  ;;  %vm184_vm0 = vcmask 254976   ;;  %s320_s8 = smov [#allocation7]   ;;  %v40_v0 = vld [vmem:[#allocation2] sm:$0x3] }
  0x28   :  { %s363_s9 = sshll.u32 %s320_s8, 4  ;;  %v219_v1 = vld [vmem:[#allocation5] ss:$0 sm:$0xff]  ;;  %v41_v2 = vld [vmem:[#allocation2 + $0x2] sm:$0x3]  ;;  %s207_s9 = int_to_ptr.vmem [resolvable:$true] %s363_s9 }
  0x29   :  { %v168_v3 = vadd.f32 %v219_v1, %v40_v0  ;;  %v220_v4 = vld [vmem:[#allocation5 + $0x1] ss:$0 sm:$0xff]  ;;  %v42_v5 = vld [vmem:[#allocation2 + $0x4] sm:$0x3]  ;;  %v221_v6 = vld [vmem:[#allocation5 + $0x2] ss:$0 sm:$0xff]  ;;  %p291_p3 = scmp.lt.s32.totalorder %s207_s9, %s207_s9 }
  0x2a   :  { %v169_v7 = vadd.f32 %v220_v4, %v41_v2  ;;  %v170_v8 = vadd.f32 %v221_v6, %v42_v5  ;;  %v43_v9 = vld [vmem:[#allocation2 + $0x6] sm:$0x3]  ;;  %v222_v10 = vld [vmem:[#allocation5 + $0x3] ss:$0 sm:$0xff]  ;;  %v44_v11 = vld [vmem:[#allocation2 + $0x8] sm:$0x3] }
  0x2b   :  { %185 = vst.msk [vmem:[#allocation7] sm:$0x3] %vm184_vm0, %v168_v3  ;;  %v171_v12 = vadd.f32 %v222_v10, %v43_v9  ;;  %v223_v13 = vld [vmem:[#allocation5 + $0x4] ss:$0 sm:$0xff]  ;;  %v45_v14 = vld [vmem:[#allocation2 + $0xa] sm:$0x3] }
  0x2c   :  { %v224_v15 = vld [vmem:[#allocation5 + $0x5] ss:$0 sm:$0xff]  ;;  %186 = vst.msk [vmem:[#allocation7 + $0x2] sm:$0x3] %vm184_vm0, %v169_v7  ;;  %187 = vst.msk [vmem:[#allocation7 + $0x4] sm:$0x3] %vm184_vm0, %v170_v8  ;;  %v172_v16 = vadd.f32 %v223_v13, %v44_v11 }
  0x2d   :  { %v173_v17 = vadd.f32 %v224_v15, %v45_v14  ;;  %v46_v18 = vld [vmem:[#allocation2 + $0xc] sm:$0x3]  ;;  %v225_v19 = vld [vmem:[#allocation5 + $0x6] ss:$0 sm:$0xff]  ;;  %v47_v20 = vld [vmem:[#allocation2 + $0xe] sm:$0x3] }
  0x2e   :  { %188 = vst.msk [vmem:[#allocation7 + $0x6] sm:$0x3] %vm184_vm0, %v171_v12  ;;  %v174_v21 = vadd.f32 %v225_v19, %v46_v18  ;;  %v226_v22 = vld [vmem:[#allocation5 + $0x7] ss:$0 sm:$0xff]  ;;  %v48_v23 = vld [vmem:[#allocation2 + $0x10] sm:$0x3] }
  0x2f   :  { %v227_v24 = vld [vmem:[#allocation5 + $0x8] ss:$0 sm:$0xff]  ;;  %189 = vst.msk [vmem:[#allocation7 + $0x8] sm:$0x3] %vm184_vm0, %v172_v16  ;;  %190 = vst.msk [vmem:[#allocation7 + $0xa] sm:$0x3] %vm184_vm0, %v173_v17  ;;  %v175_v25 = vadd.f32 %v226_v22, %v47_v20 }
  0x30   :  { %v176_v26 = vadd.f32 %v227_v24, %v48_v23  ;;  %v49_v27 = vld [vmem:[#allocation2 + $0x12] sm:$0x3]  ;;  %v228_v28 = vld [vmem:[#allocation5 + $0x9] ss:$0 sm:$0xff]  ;;  %v50_v29 = vld [vmem:[#allocation2 + $0x14] sm:$0x3] }
  0x31   :  { %191 = vst.msk [vmem:[#allocation7 + $0xc] sm:$0x3] %vm184_vm0, %v174_v21  ;;  %v177_v30 = vadd.f32 %v228_v28, %v49_v27  ;;  %v229_v31 = vld [vmem:[#allocation5 + $0xa] ss:$0 sm:$0xff]  ;;  %v51_v32 = vld [vmem:[#allocation2 + $0x16] sm:$0x3] }
  0x32   :  { %v230_v33 = vld [vmem:[#allocation5 + $0xb] ss:$0 sm:$0xff]  ;;  %192 = vst.msk [vmem:[#allocation7 + $0xe] sm:$0x3] %vm184_vm0, %v175_v25  ;;  %193 = vst.msk [vmem:[#allocation7 + $0x10] sm:$0x3] %vm184_vm0, %v176_v26  ;;  %v178_v34 = vadd.f32 %v229_v31, %v50_v29 }
  0x33   :  { %v179_v35 = vadd.f32 %v230_v33, %v51_v32  ;;  %v52_v36 = vld [vmem:[#allocation2 + $0x18] sm:$0x3]  ;;  %v231_v37 = vld [vmem:[#allocation5 + $0xc] ss:$0 sm:$0xff]  ;;  %v53_v38 = vld [vmem:[#allocation2 + $0x1a] sm:$0x3] }
  0x34   :  { %194 = vst.msk [vmem:[#allocation7 + $0x12] sm:$0x3] %vm184_vm0, %v177_v30  ;;  %v180_v39 = vadd.f32 %v231_v37, %v52_v36  ;;  %v232_v40 = vld [vmem:[#allocation5 + $0xd] ss:$0 sm:$0xff]  ;;  %v54_v41 = vld [vmem:[#allocation2 + $0x1c] sm:$0x3] }
  0x35   :  { %v233_v42 = vld [vmem:[#allocation5 + $0xe] ss:$0 sm:$0xff]  ;;  %195 = vst.msk [vmem:[#allocation7 + $0x14] sm:$0x3] %vm184_vm0, %v178_v34  ;;  %196 = vst.msk [vmem:[#allocation7 + $0x16] sm:$0x3] %vm184_vm0, %v179_v35  ;;  %v181_v43 = vadd.f32 %v232_v40, %v53_v38 }
  0x36   :  { %v182_v44 = vadd.f32 %v233_v42, %v54_v41  ;;  %v55_v45 = vld [vmem:[#allocation2 + $0x1e] sm:$0x3]  ;;  %v234_v46 = vld [vmem:[#allocation5 + $0xf] ss:$0 sm:$0xff]  ;;  %197 = vst.msk [vmem:[#allocation7 + $0x18] sm:$0x3] %vm184_vm0, %v180_v39 }
  0x37   :  { %v183_v47 = vadd.f32 %v234_v46, %v55_v45  ;;  %198 = vst.msk [vmem:[#allocation7 + $0x1a] sm:$0x3] %vm184_vm0, %v181_v43  ;;  %s286_s1 = scalar_lea.vmem %s207_s9, 512 }
  0x38   :  { %199 = vst.msk [vmem:[#allocation7 + $0x1c] sm:$0x3] %vm184_vm0, %v182_v44  ;;  %p287_p2 = scmp.ne.s32.totalorder %s207_s9, %s286_s1  ;;  %p292_p4 = scmp.lt.s32.totalorder %s286_s1, %s286_s1 }
  0x39   :  { %200 = vst.msk [vmem:[#allocation7 + $0x1e] sm:$0x3] %vm184_vm0, %v183_v47 }
  0x3a   :  { %p293_p5 = por %p292_p4, %p291_p3 }
  0x3c   :  { %p294_p6 = pnand %p293_p5, %p287_p2 }
  0x3e   :  { %297 = shalt.err (!%p294_p6)
}
  0x3f   :  { %s298_s12 = scalar_lea.hbm %s399_s2, 512 }
  0x40   :  { %p299_p7 = scmp.ne.s32.totalorder %s399_s2, %s298_s12  ;;  %p302_p8 = scmp.lt.u32.totalorder %s298_s12, %s399_s2 }
  0x42   :  { %p304_p9 = pnand %p302_p8, %p299_p7 }
  0x44   :  { %307 = shalt.err (!%p304_p9)
}
  0x45   :  { %212 = dma.vmem_to_hbm [thread:$0]  %s207_s9, 512, %s399_s2, [#allocation4], %s315_s19, %s315_s19, %s316_s20  }
  0x46   :  { %312 = dma.done.wait [#allocation4], 512  }
  0x47   :  { %313 = vsyncadd [#allocation4], 4294966784 }
  0x48   :  { %216 = vsyncpa [#allocation3], 1 }
  0x49   :  { %217 = vsyncpa [#allocation6], 1 }
  0x4a   :  { %218 = vsyncpa [#allocation4], 1 }

</bundles_post_ra>
